<compile_context>
chip_gen: v7x
topology: tpu7x:2x2x1
jax: 0.10.0
libtpu: 0.0.40
codegen_flags: <defaults>
</compile_context>

<pallas_src>
import functools

import jax
import jax.numpy as jnp
import numpy as np
from jax import lax
from jax.experimental import pallas as pl
from jax.experimental.pallas import tpu as pltpu


def _recall_loss_kernel(x_ref, t_ref, o_ref, acc_ref, *,
                        smooth, ignore_index, total_l, tile_l, ragged):
    # x_ref: (1, C, TL) logits tile (f32 or bf16); t_ref: (1, 1, TL) i32 tile
    # acc_ref: (C, 4) f32 scratch; columns = [tot_c, tp_c, A_c, validcount_c]
    l_step = pl.program_id(1)

    @pl.when(l_step == 0)
    def _init():
        acc_ref[...] = jnp.zeros_like(acc_ref)

    x = x_ref[0].astype(jnp.float32)     # upcast bf16 in-kernel (halves HBM)
    tgt = t_ref[0]                       # (1, TL) int32
    C, TL = x.shape

    if ragged:
        # Last L-tile may extend past the array end: out-of-range lanes hold
        # undefined bits.  Zero x (so exp/log stay finite) and force the
        # target to ignore_index (so counts/NLL get zero contribution).
        lane = l_step * tile_l + lax.broadcasted_iota(jnp.int32, (1, TL), 1)
        in_range = lane < total_l
        x = jnp.where(in_range, x, 0.0)
        tgt = jnp.where(in_range, tgt, jnp.int32(ignore_index))

    class_col = lax.broadcasted_iota(jnp.int32, (C, 1), 0)          # (C, 1)

    # prediction = argmax over classes, first-index tie-break (torch.max)
    m = jnp.max(x, axis=0, keepdims=True)                           # (1, TL)
    idx_cand = jnp.where(x == m, class_col, jnp.int32(C))           # (C, TL)
    pred = jnp.min(idx_cand, axis=0, keepdims=True)                 # (1, TL)

    eq_t = (class_col == tgt).astype(jnp.float32)                   # (C, TL)
    corr = (pred == tgt).astype(jnp.float32)                        # (1, TL)
    valid = (tgt != jnp.int32(ignore_index)).astype(jnp.float32)    # (1, TL)

    # NLL of the target class without materializing the full log-softmax
    x_g = jnp.sum(eq_t * x, axis=0, keepdims=True)                  # (1, TL)
    lse = jnp.log(jnp.sum(jnp.exp(x - m), axis=0, keepdims=True))   # (1, TL)
    contrib = valid * ((m + lse) - x_g)                             # (1, TL)

    # One MXU contraction replaces four (C,TL) VPU multiplies + XLU lane
    # reductions: columns of the result are tot_c, tp_c, A_c, validcount_c.
    stacked = jnp.concatenate(
        [jnp.ones_like(valid), corr, contrib, valid], axis=0)       # (4, TL)
    acc_ref[...] += lax.dot_general(
        eq_t, stacked, (((1,), (1,)), ((), ())),
        preferred_element_type=jnp.float32)                         # (C, 4)

    @pl.when(l_step == pl.num_programs(1) - 1)
    def _finalize():
        acc = acc_ref[...]
        tot, tp = acc[:, 0:1], acc[:, 1:2]
        a, vd = acc[:, 2:3], acc[:, 3:4]
        w = 1.0 - (tp + smooth) / (tot + smooth)                    # (C, 1)
        num = jnp.sum(w * a, axis=0, keepdims=True)                 # (1, 1)
        den = jnp.sum(w * vd, axis=0, keepdims=True)                # (1, 1)
        loss = num / den
        o_ref[...] = jnp.broadcast_to(loss[None], o_ref.shape)


def _vmem_capacity_bytes():
    """Generation-aware VMEM capacity; conservative v7x fallback (64 MiB)."""
    try:
        return int(pltpu.get_tpu_info().vmem_capacity_bytes)
    except Exception:
        return 64 << 20


def _choose_tile(C, L, x_itemsize, vmem_cap, max_tl=16384):
    """Largest lane-tile (multiple of 128) fitting a ~45% VMEM budget,
    counting double-buffered input tiles AND ~5 (C,TL)-sized f32 compiler
    temporaries (eq_t, idx_cand, exp(x-m), selects)."""
    budget = int(vmem_cap * 0.45)
    per_lane = 2 * (C * x_itemsize + 4) + 5 * C * 4
    tl = (budget // per_lane) // 128 * 128
    tl = max(128, min(int(tl), max_tl))
    return min(tl, pl.cdiv(L, 128) * 128)


def recall_loss(logits, target, *, ignore_index=255, smooth=1e-5, tile_l=None):
    """logits: (N, C, H, W) float32/bfloat16; target: (N, H, W) int.
    Returns (N,) float32 per-sample recall-weighted NLL ('mean' reduction)."""
    N, C = logits.shape[:2]
    L = int(np.prod(logits.shape[2:]))

    x = logits.reshape(N, C, L)
    if x.dtype != jnp.float32 and x.dtype != jnp.bfloat16:
        x = x.astype(jnp.float32)        # keep bf16 native in HBM
    t = target.reshape(N, 1, L).astype(jnp.int32)

    vmem_cap = _vmem_capacity_bytes()
    TL = tile_l if tile_l is not None else _choose_tile(
        C, L, jnp.dtype(x.dtype).itemsize, vmem_cap)
    TL = max(128, (int(TL) // 128) * 128)

    num_l = pl.cdiv(L, TL)
    ragged = (L % TL) != 0               # handled in-kernel, no HBM pad copy

    kernel = functools.partial(
        _recall_loss_kernel, smooth=smooth, ignore_index=ignore_index,
        total_l=L, tile_l=TL, ragged=ragged)

    x_bytes = jnp.dtype(x.dtype).itemsize
    cost = pl.CostEstimate(
        flops=15 * N * C * L,
        transcendentals=N * C * L,
        bytes_accessed=N * C * L * x_bytes + N * L * 4 + N * 128 * 4,
    )

    out = pl.pallas_call(
        kernel,
        out_shape=jax.ShapeDtypeStruct((N, 1, 128), jnp.float32),
        grid=(N, num_l),
        in_specs=[
            pl.BlockSpec((1, C, TL), lambda n, l: (n, 0, l)),
            pl.BlockSpec((1, 1, TL), lambda n, l: (n, 0, l)),
        ],
        out_specs=pl.BlockSpec((1, 1, 128), lambda n, l: (n, 0, 0)),
        scratch_shapes=[
            pltpu.VMEM((C, 4), jnp.float32),   # [tot, tp, A, valid-count]
        ],
        compiler_params=pltpu.CompilerParams(
            dimension_semantics=("parallel", "arbitrary"),
            vmem_limit_bytes=int(vmem_cap * 3 // 4),
        ),
        cost_estimate=cost,
    )(x, t)
    return out[:, 0, 0]


def recall_loss_ref(logits, target, *, ignore_index=255, smooth=1e-5):
    """Pure-JAX reference mirroring the PyTorch module (reduction='mean').
    Target indices are clipped before gathers so ignore_index pixels (which
    are masked out by `valid`) cannot inject NaN via OOB 'fill' semantics."""
    N, C = logits.shape[:2]
    x = logits.reshape(N, C, -1).astype(jnp.float32)
    t = target.reshape(N, -1).astype(jnp.int32)
    pred = jnp.argmax(x, axis=1)
    oh_t = jax.nn.one_hot(t, C, axis=1, dtype=jnp.float32)
    oh_p = jax.nn.one_hot(pred, C, axis=1, dtype=jnp.float32)
    tp = jnp.sum(oh_t * oh_p, axis=2)
    tot = jnp.sum(oh_t, axis=2)
    w = 1.0 - (tp + smooth) / (tot + smooth)                     # (N, C)
    logp = jax.nn.log_softmax(x, axis=1)
    t_safe = jnp.clip(t, 0, C - 1)
    logp_g = jnp.take_along_axis(logp, t_safe[:, None, :], axis=1)[:, 0, :]
    w_i = jnp.take_along_axis(w, t_safe, axis=1)
    valid = (t != ignore_index).astype(jnp.float32)
    num = jnp.sum(valid * w_i * (-logp_g), axis=1)
    den = jnp.sum(valid * w_i, axis=1)
    return num / den


if __name__ == "__main__":
    key = jax.random.PRNGKey(0)
    k1, k2 = jax.random.split(key)

    N, C, H, W = 2, 4, 16, 16
    logits = jax.random.normal(k1, (N, C, H, W), dtype=jnp.float32)
    target = jax.random.randint(k2, (N, H, W), 0, C, dtype=jnp.int32)
    # a few ignore_index pixels to exercise the valid-mask path
    target = target.at[:, 0, :4].set(255)

    ref = recall_loss_ref(logits, target)

    # default tile (single L-step at this size)
    out = jax.block_until_ready(recall_loss(logits, target))
    np.testing.assert_allclose(np.asarray(out), np.asarray(ref),
                               rtol=1e-5, atol=1e-6)

    # forced small tile to exercise the multi-step streaming accumulation
    out_tiled = jax.block_until_ready(recall_loss(logits, target, tile_l=128))
    np.testing.assert_allclose(np.asarray(out_tiled), np.asarray(ref),
                               rtol=1e-5, atol=1e-6)

    # bf16 logits DMA'd natively and upcast in-kernel
    logits_bf16 = logits.astype(jnp.bfloat16)
    ref_bf16 = recall_loss_ref(logits_bf16, target)
    out_bf16 = jax.block_until_ready(recall_loss(logits_bf16, target,
                                                 tile_l=128))
    np.testing.assert_allclose(np.asarray(out_bf16), np.asarray(ref_bf16),
                               rtol=1e-4, atol=1e-5)

    # ragged spatial size (L = 135, not a multiple of the 128-lane tile):
    # exercises the in-kernel tail mask that replaced the HBM-side pad copy
    N2, C2, H2, W2 = 2, 5, 9, 15
    logits2 = jax.random.normal(k1, (N2, C2, H2, W2), dtype=jnp.float32)
    target2 = jax.random.randint(k2, (N2, H2, W2), 0, C2, dtype=jnp.int32)
    target2 = target2.at[:, 0, :3].set(255)
    ref2 = recall_loss_ref(logits2, target2)
    out2 = jax.block_until_ready(recall_loss(logits2, target2, tile_l=128))
    np.testing.assert_allclose(np.asarray(out2), np.asarray(ref2),
                               rtol=1e-5, atol=1e-6)

    print("KERNEL_OK")
</pallas_src>

<mosaic_0001>
module attributes {stable_mosaic.version = 11 : i64} {
  func.func @_recall_loss_kernel(%arg0: i32, %arg1: i32, %arg2: memref<1x4x256xf32, #tpu.memory_space<vmem>>, %arg3: memref<1x1x256xi32, #tpu.memory_space<vmem>>, %arg4: memref<1x1x128xf32, #tpu.memory_space<vmem>>, %arg5: memref<4x4xf32, #tpu.memory_space<vmem>>) attributes {dimension_semantics = [#tpu.dimension_semantics<parallel>, #tpu.dimension_semantics<arbitrary>], iteration_bounds = array<i64: 2, 1>, scalar_prefetch = 0 : i64, scratch_operands = 1 : i64, tpu.core_type = #tpu.core_type<tc>, window_params = [{transform_indices = @transform_0, window_bounds = array<i64: 1, 4, 256>}, {transform_indices = @transform_1, window_bounds = array<i64: 1, 1, 256>}, {transform_indices = @transform_2, window_bounds = array<i64: 1, 1, 128>}]} {
    %c0_i32 = arith.constant 0 : i32
    %0 = arith.cmpi eq, %arg1, %c0_i32 : i32
    %1 = arith.extui %0 : i1 to i32
    %c0_i32_0 = arith.constant 0 : i32
    %2 = arith.cmpi ne, %1, %c0_i32_0 : i32
    scf.if %2 {
      %cst_17 = arith.constant 0.000000e+00 : f32
      %51 = vector.broadcast %cst_17 : f32 to vector<4x4xf32>
      %c0_18 = arith.constant 0 : index
      %c0_19 = arith.constant 0 : index
      %52 = vector.load %arg5[%c0_18, %c0_19] : memref<4x4xf32, #tpu.memory_space<vmem>>, vector<4x4xf32>
      tpu.vector_store %arg5[%c0_18, %c0_19], %51 {strides = array<i32>} : memref<4x4xf32, #tpu.memory_space<vmem>>, vector<4x4xf32>,
    } else {
    }
    %c0 = arith.constant 0 : index
    %c0_1 = arith.constant 0 : index
    %c0_2 = arith.constant 0 : index
    %3 = vector.load %arg2[%c0, %c0_1, %c0_2] : memref<1x4x256xf32, #tpu.memory_space<vmem>>, vector<1x4x256xf32>
    %4 = vector.shape_cast %3 : vector<1x4x256xf32> to vector<4x256xf32>
    %c0_3 = arith.constant 0 : index
    %c0_4 = arith.constant 0 : index
    %c0_5 = arith.constant 0 : index
    %5 = vector.load %arg3[%c0_3, %c0_4, %c0_5] : memref<1x1x256xi32, #tpu.memory_space<vmem>>, vector<1x1x256xi32>
    %6 = vector.shape_cast %5 : vector<1x1x256xi32> to vector<1x256xi32>
    %7 = tpu.iota {dimensions = array<i32: 0>} : vector<4x1xi32>
    %cst = arith.constant dense<0xFF800000> : vector<256xf32>
    %8 = vector.multi_reduction <maximumf>, %4, %cst [0] : vector<4x256xf32> to vector<256xf32>
    %9 = vector.shape_cast %8 : vector<256xf32> to vector<1x256xf32>
    %10 = vector.broadcast %9 : vector<1x256xf32> to vector<4x256xf32>
    %11 = arith.cmpf oeq, %4, %10 : vector<4x256xf32>
    %c4_i32 = arith.constant 4 : i32
    %12 = vector.shape_cast %7 : vector<4x1xi32> to vector<4x1xi32>
    %13 = vector.broadcast %12 : vector<4x1xi32> to vector<4x256xi32>
    %14 = vector.broadcast %c4_i32 : i32 to vector<4x256xi32>
    %15 = arith.select %11, %13, %14 : vector<4x256xi1>, vector<4x256xi32>
    %cst_6 = arith.constant dense<2147483647> : vector<256xi32>
    %16 = vector.multi_reduction <minsi>, %15, %cst_6 [0] : vector<4x256xi32> to vector<256xi32>
    %17 = vector.shape_cast %16 : vector<256xi32> to vector<1x256xi32>
    %18 = vector.broadcast %7 : vector<4x1xi32> to vector<4x256xi32>
    %19 = vector.broadcast %6 : vector<1x256xi32> to vector<4x256xi32>
    %20 = arith.cmpi eq, %18, %19 : vector<4x256xi32>
    %21 = arith.extui %20 : vector<4x256xi1> to vector<4x256xi32>
    %22 = arith.sitofp %21 : vector<4x256xi32> to vector<4x256xf32>
    %23 = arith.cmpi eq, %17, %6 : vector<1x256xi32>
    %24 = arith.extui %23 : vector<1x256xi1> to vector<1x256xi32>
    %25 = arith.sitofp %24 : vector<1x256xi32> to vector<1x256xf32>
    %c255_i32 = arith.constant 255 : i32
    %26 = vector.broadcast %c255_i32 : i32 to vector<1x256xi32>
    %27 = arith.cmpi ne, %6, %26 : vector<1x256xi32>
    %28 = arith.extui %27 : vector<1x256xi1> to vector<1x256xi32>
    %29 = arith.sitofp %28 : vector<1x256xi32> to vector<1x256xf32>
    %30 = arith.mulf %22, %4 : vector<4x256xf32>
    %cst_7 = arith.constant dense<0.000000e+00> : vector<256xf32>
    %31 = vector.multi_reduction <add>, %30, %cst_7 [0] : vector<4x256xf32> to vector<256xf32>
    %32 = vector.shape_cast %31 : vector<256xf32> to vector<1x256xf32>
    %33 = vector.broadcast %9 : vector<1x256xf32> to vector<4x256xf32>
    %34 = arith.subf %4, %33 : vector<4x256xf32>
    %35 = math.exp %34 : vector<4x256xf32>
    %cst_8 = arith.constant dense<0.000000e+00> : vector<256xf32>
    %36 = vector.multi_reduction <add>, %35, %cst_8 [0] : vector<4x256xf32> to vector<256xf32>
    %37 = vector.shape_cast %36 : vector<256xf32> to vector<1x256xf32>
    %38 = math.log %37 : vector<1x256xf32>
    %39 = arith.addf %9, %38 : vector<1x256xf32>
    %40 = arith.subf %39, %32 : vector<1x256xf32>
    %41 = arith.mulf %29, %40 : vector<1x256xf32>
    %cst_9 = arith.constant 1.000000e+00 : f32
    %42 = vector.broadcast %cst_9 : f32 to vector<1x256xf32>
    %43 = tpu.concatenate %42, %25, %41, %29 in 0 : vector<1x256xf32>, vector<1x256xf32>, vector<1x256xf32>, vector<1x256xf32> -> vector<4x256xf32>
    %c0_10 = arith.constant 0 : index
    %c0_11 = arith.constant 0 : index
    %44 = vector.load %arg5[%c0_10, %c0_11] : memref<4x4xf32, #tpu.memory_space<vmem>>, vector<4x4xf32>
    %cst_12 = arith.constant dense<0.000000e+00> : vector<4x4xf32>
    %45 = tpu.matmul %22, %43, %cst_12 {dimension_numbers = #tpu.dot_dimension_numbers<[1], [1], [0], [0], [0, 0, 1, 0], [], []>} : vector<4x256xf32>, vector<4x256xf32>, vector<4x4xf32> -> vector<4x4xf32>
    %46 = arith.addf %44, %45 : vector<4x4xf32>
    %c0_13 = arith.constant 0 : index
    %c0_14 = arith.constant 0 : index
    %47 = vector.load %arg5[%c0_13, %c0_14] : memref<4x4xf32, #tpu.memory_space<vmem>>, vector<4x4xf32>
    tpu.vector_store %arg5[%c0_13, %c0_14], %46 {strides = array<i32>} : memref<4x4xf32, #tpu.memory_space<vmem>>, vector<4x4xf32>,
    %c0_i32_15 = arith.constant 0 : i32
    %48 = arith.cmpi eq, %arg1, %c0_i32_15 : i32
    %49 = arith.extui %48 : i1 to i32
    %c0_i32_16 = arith.constant 0 : i32
    %50 = arith.cmpi ne, %49, %c0_i32_16 : i32
    scf.if %50 {
      %c0_17 = arith.constant 0 : index
      %c0_18 = arith.constant 0 : index
      %51 = vector.load %arg5[%c0_17, %c0_18] : memref<4x4xf32, #tpu.memory_space<vmem>>, vector<4x4xf32>
      %52 = vector.extract_strided_slice %51 {offsets = [0, 0], sizes = [4, 1], strides = [1, 1]} : vector<4x4xf32> to vector<4x1xf32>
      %53 = vector.extract_strided_slice %51 {offsets = [0, 1], sizes = [4, 1], strides = [1, 1]} : vector<4x4xf32> to vector<4x1xf32>
      %54 = vector.extract_strided_slice %51 {offsets = [0, 2], sizes = [4, 1], strides = [1, 1]} : vector<4x4xf32> to vector<4x1xf32>
      %55 = vector.extract_strided_slice %51 {offsets = [0, 3], sizes = [4, 1], strides = [1, 1]} : vector<4x4xf32> to vector<4x1xf32>
      %cst_19 = arith.constant 9.99999974E-6 : f32
      %56 = vector.broadcast %cst_19 : f32 to vector<4x1xf32>
      %57 = arith.addf %53, %56 : vector<4x1xf32>
      %cst_20 = arith.constant 9.99999974E-6 : f32
      %58 = vector.broadcast %cst_20 : f32 to vector<4x1xf32>
      %59 = arith.addf %52, %58 : vector<4x1xf32>
      %60 = arith.divf %57, %59 : vector<4x1xf32>
      %cst_21 = arith.constant 1.000000e+00 : f32
      %61 = vector.broadcast %cst_21 : f32 to vector<4x1xf32>
      %62 = arith.subf %61, %60 : vector<4x1xf32>
      %63 = arith.mulf %62, %54 : vector<4x1xf32>
      %cst_22 = arith.constant dense<0.000000e+00> : vector<1xf32>
      %64 = vector.multi_reduction <add>, %63, %cst_22 [0] : vector<4x1xf32> to vector<1xf32>
      %65 = vector.shape_cast %64 : vector<1xf32> to vector<1x1xf32>
      %66 = arith.mulf %62, %55 : vector<4x1xf32>
      %cst_23 = arith.constant dense<0.000000e+00> : vector<1xf32>
      %67 = vector.multi_reduction <add>, %66, %cst_23 [0] : vector<4x1xf32> to vector<1xf32>
      %68 = vector.shape_cast %67 : vector<1xf32> to vector<1x1xf32>
      %69 = arith.divf %65, %68 : vector<1x1xf32>
      %70 = vector.shape_cast %69 : vector<1x1xf32> to vector<1x1x1xf32>
      %71 = vector.shape_cast %70 : vector<1x1x1xf32> to vector<1x1x1xf32>
      %72 = vector.broadcast %71 : vector<1x1x1xf32> to vector<1x1x128xf32>
      %c0_24 = arith.constant 0 : index
      %c0_25 = arith.constant 0 : index
      %c0_26 = arith.constant 0 : index
      %73 = vector.load %arg4[%c0_24, %c0_25, %c0_26] : memref<1x1x128xf32, #tpu.memory_space<vmem>>, vector<1x1x128xf32>
      tpu.vector_store %arg4[%c0_24, %c0_25, %c0_26], %72 {strides = array<i32>} : memref<1x1x128xf32, #tpu.memory_space<vmem>>, vector<1x1x128xf32>,
    } else {
    }
    return
  }
  func.func @transform_0(%arg0: i32, %arg1: i32) -> (i32, i32, i32) {
    %c0_i32 = arith.constant 0 : i32
    %c0_i32_0 = arith.constant 0 : i32
    return %arg0, %c0_i32, %arg1 : i32, i32, i32
  }
  func.func @transform_1(%arg0: i32, %arg1: i32) -> (i32, i32, i32) {
    %c0_i32 = arith.constant 0 : i32
    %c0_i32_0 = arith.constant 0 : i32
    return %arg0, %c0_i32, %arg1 : i32, i32, i32
  }
  func.func @transform_2(%arg0: i32, %arg1: i32) -> (i32, i32, i32) {
    %c0_i32 = arith.constant 0 : i32
    %c0_i32_0 = arith.constant 0 : i32
    %c0_i32_1 = arith.constant 0 : i32
    return %arg0, %c0_i32, %c0_i32_0 : i32, i32, i32
  }
}

</mosaic_0001>

<bundles_post_ra>
// kernel: tpu_custom_call.1
= control target key start
LH: loop header
LB: loop body
LE: loop exit
PB: predicated region body
PF: predicated region fallthrough
CT: control target
= control target key end

     0   :  { %7 = vsyncpa [#allocation4], 0  ;;  %s1205_s0 = inlined_call_operand.hbm [shape: f32[2,4,256], index: 0, kind: input, shape index: {}]   ;;  %s1206_s1 = inlined_call_operand.hbm [shape: s32[2,1,256], index: 1, kind: input, shape index: {}]   ;;  %s1207_s2 = inlined_call_operand.hbm [shape: f32[2,1,128], index: 2, kind: output, shape index: {}]  }
   0x1   :  { %9 = vsyncpa [#allocation4 + $0x1], 0 }
   0x2   :  { %10 = vsyncpa [#allocation7], 0 }
   0x3   :  { %12 = vsyncpa [#allocation7 + $0x1], 0 }
   0x4   :  { %13 = vsyncpa [#allocation5], 0 }
   0x5   :  { %15 = vsyncpa [#allocation5 + $0x1], 0  ;;  %s925_s9 = smov 0   ;;  %s927_s10 = smov 0  }
   0x6   :  { %s929_s11 = smov 0   ;;  %s931_s12 = smov 0  }
   0x7   :  { %s933_s13 = smov 0   ;;  %s935_s14 = smov 0  }
   0x8 LB: > { %s638_s15 = sadd.s32 4294967295, %s897_s14   ;;  %s639_s16 = sadd.s32 4294967294, %s897_s14   ;;  %s897_s14 = sphi %s935_s14, %s21_s14   ;;  %s893_s13 = sphi %s933_s13, %s1227_s13   ;;  %s889_s12 = sphi %s931_s12, %s1226_s12   ;;  %s885_s11 = sphi %s929_s11, %s1225_s11   ;;  %s881_s10 = sphi %s927_s10, %s1224_s10   ;;  %s877_s9 = sphi %s925_s9, %s1223_s9  }
   0x9   : > { %s33_s17 = sadd.s32 1, %s893_s13  ;;  %s42_s18 = sadd.s32 1, %s885_s11 }
   0xa   : > { %p35_p0 = scmp.ge.s32.totalorder %s33_s17, 2  ;;  %p49_p1 = scmp.ne.s32.totalorder %s885_s11, %s881_s10 }
   0xb   : > { %p50_p2 = scmp.eq.s32.totalorder %s897_s14, 0  ;;  %p55_p3 = scmp.ne.s32.totalorder %s881_s10, %s877_s9 }
   0xc   : > { %s1229_s17 = smov (%p35_p0, %s33_s17), 0  ;;  %p56_p5 = scmp.eq.s32.totalorder %s638_s15, 0 }
   0xd   : > { %p966_p4 = por %p50_p2, %p49_p1  ;;  %s37_s20 = ssub.s32 %s893_s13, %s1229_s17 }
   0xe   : > { %p107_p6 = scmp.eq.s32.totalorder %s638_s15, 1  ;;  %p40_p7 = scmp.eq.s32.totalorder %s37_s20, 0 }
   0xf   : > { %p972_p8 = por %p56_p5, %p55_p3  ;;  %p113_p10 = scmp.eq.s32.totalorder %s639_s16, 1 }
  0x10   : > { %p976_p9 = por %p107_p6, %p49_p1  ;;  %p680_p13 = scmp.lt.s32.totalorder %s897_s14, 2 }
  0x11   : > { %s1211_s21 = scalar_select %p972_p8, 1, 0 }
  0x12   : > { %s1212_s22 = scalar_select %p976_p9, 1, 0 }
  0x13   : > { %s981_s23 = scalar_select %p40_p7, %s885_s11, %s42_s18  }
  0x14   : > { %p983_p11 = por %p113_p10, %p55_p3  ;;  %s990_s25 = sand.u32 1, %s885_s11  }
  0x15   : > { %s642_s26 = sshll.u32 %s990_s25, 3  ;;  %s661_s27 = sshll.u32 %s893_s13, 7 }
  0x16   : > { %s1213_s24 = scalar_select %p983_p11, 1, 0 }
  0x17   : > { %s997_s30 = scalar_lea.hbm %s1205_s0, %s661_s27  ;;  %s137_s3 = scalar_lea.vmem [#allocation3], %s642_s26 }
  0x18   : > { %s147_s4 = sshll.u32 %s137_s3, 4  ;;  %p1003_p0 = pnand %p680_p13, %p966_p4  ;;  %s999_s4 = int_to_ptr.vmem [resolvable:$true] %s147_s4 }
  0x19   : > { %s134_s6 = scalar_lea.sflag [#allocation4], %s990_s25  ;;  %s751_s7 = scalar_lea.hbm %s997_s30, 128 }
  0x1a   : > { %p752_p3 = scmp.ne.s32.totalorder %s997_s30, %s751_s7  ;;  %p753_p5 = pneg %p1003_p0 }
  0x1b   : > { %s756_s16 = scalar_lea.hbm %s1205_s0, 256  ;;  %p757_p4 = scmp.lt.u32.totalorder %s997_s30, %s1205_s0 }
  0x1c   : > { %p754_p6 = pnand %p753_p5, %p752_p3  ;;  %p758_p10 = scmp.lt.u32.totalorder %s756_s16, %s751_s7 }
  0x1d   : > { %p760_p12 = scmp.lt.u32.totalorder %s751_s7, %s997_s30 }
  0x1e   : > { %p755_p7 = pneg %p754_p6  ;;  %p759_p13 = por %p758_p10, %p757_p4 }
  0x20   : > { %p761_p1 = por %p760_p12, %p759_p13 }
  0x22   : > { %p762_p2 = pnand %p761_p1, %p755_p7 }
  0x24   : > { %765 = shalt.err (!%p762_p2)
}
  0x25   : > { %s766_s20 = scalar_lea.vmem %s999_s4, 128  ;;  %s899_s26 = smov [#allocation3]  }
  0x26   : > { %p767_p3 = scmp.ne.s32.totalorder %s999_s4, %s766_s20  ;;  %s771_s27 = sshll.u32 %s899_s26, 4  ;;  %s772_s27 = int_to_ptr.vmem [resolvable:$false] %s771_s27 }
  0x27   : > { %s773_s28 = scalar_lea.vmem %s772_s27, 256  ;;  %p774_p9 = scmp.lt.s32.totalorder %s999_s4, %s772_s27 }
  0x28   : > { %p769_p6 = pnand %p767_p3, %p753_p5  ;;  %p775_p4 = scmp.lt.s32.totalorder %s773_s28, %s766_s20 }
  0x2a   : > { %p770_p11 = pneg %p769_p6  ;;  %p776_p10 = por %p775_p4, %p774_p9 }
  0x2c   : > { %p777_p12 = pnand %p776_p10, %p770_p11 }
  0x2e   : > { %780 = shalt.err (!%p777_p12)
}
  0x2f   : > { %672 = dma.hbm_to_vmem [thread:$0]  (!%p1003_p0), %s997_s30, 128, %s999_s4, %s134_s6  }
  0x30   : > { %p1215_p1 = scmp.lt.s32.totalorder %s897_s14, 3  ;;  %p1216_p2 = scmp.ge.s32.totalorder %s897_s14, 1 }
  0x31   : > { %s645_s3 = sshll.u32 %s990_s25, 1  ;;  %s662_s7 = sshll.u32 %s893_s13, 5 }
  0x32   : > { %p1039_p7 = pnand %p1216_p2, %p1215_p1  ;;  %s1048_s16 = scalar_lea.hbm %s1206_s1, %s662_s7 }
  0x33   : > { %s158_s18 = scalar_lea.vmem [#allocation6], %s645_s3  ;;  %s155_s30 = scalar_lea.sflag [#allocation7], %s990_s25 }
  0x34   : > { %s1217_s29 = scalar_select %p1039_p7, 1, 0 }
  0x35   : > { %s168_s19 = sshll.u32 %s158_s18, 4  ;;  %s781_s4 = scalar_lea.hbm %s1048_s16, 32  ;;  %s169_s19 = int_to_ptr.vmem [resolvable:$true] %s168_s19 }
  0x36   : > { %p782_p9 = scmp.ne.s32.totalorder %s1048_s16, %s781_s4  ;;  %s786_s26 = scalar_lea.hbm %s1206_s1, 64 }
  0x37   : > { %p787_p3 = scmp.lt.u32.totalorder %s1048_s16, %s1206_s1  ;;  %p788_p6 = scmp.lt.u32.totalorder %s786_s26, %s781_s4 }
  0x38   : > { %p784_p11 = pnand %p782_p9, %p753_p5  ;;  %p790_p10 = scmp.lt.u32.totalorder %s781_s4, %s1048_s16 }
  0x39   : > { %p789_p4 = por %p788_p6, %p787_p3 }
  0x3a   : > { %p785_p13 = pneg %p784_p11 }
  0x3b   : > { %p791_p12 = por %p790_p10, %p789_p4 }
  0x3d   : > { %p792_p1 = pnand %p791_p12, %p785_p13 }
  0x3f   : > { %795 = shalt.err (!%p792_p1)
}
  0x40   : > { %s796_s25 = scalar_lea.vmem %s169_s19, 32  ;;  %s900_s3 = smov [#allocation6]  }
  0x41   : > { %p797_p2 = scmp.ne.s32.totalorder %s169_s19, %s796_s25  ;;  %s801_s7 = sshll.u32 %s900_s3, 4  ;;  %s802_s7 = int_to_ptr.vmem [resolvable:$false] %s801_s7 }
  0x42   : > { %s803_s8 = scalar_lea.vmem %s802_s7, 64  ;;  %p804_p8 = scmp.lt.s32.totalorder %s169_s19, %s802_s7 }
  0x43   : > { %p799_p9 = pnand %p797_p2, %p753_p5  ;;  %p805_p7 = scmp.lt.s32.totalorder %s803_s8, %s796_s25 }
  0x45   : > { %p800_p11 = pneg %p799_p9  ;;  %p806_p3 = por %p805_p7, %p804_p8 }
  0x47   : > { %p807_p6 = pnand %p806_p3, %p800_p11 }
  0x49   : > { %810 = shalt.err (!%p807_p6)
}
  0x4a   : > { %675 = dma.hbm_to_vmem [thread:$0]  (!%p1003_p0), %s1048_s16, 32, %s169_s19, %s155_s30  }
  0x4b   : > { %p1218_p13 = scmp.ne.s32.totalorder %s1217_s29, 0 }
  0x4c   : > { %s1073_s15 = sand.u32 (!%p1218_p13), 1, %s881_s10   ;;  %p1219_p5 = scmp.ne.s32.totalorder (!%p1218_p13), %s1211_s21, 0 }
  0x4d   : > { %177 = sbr.rel (%p1218_p13) target bundleno = 693 (0x2b5), region = 28  ;;  %s649_s18 = sshll.u32 (!%p1218_p13), %s1073_s15, 3 }
  0x4e   : > { %s180_s4 = scalar_lea.sflag (!%p1218_p13), [#allocation4], %s1073_s15  ;;  %s183_s6 = scalar_lea.vmem (!%p1218_p13), [#allocation3], %s649_s18 }
  0x54   : > { %864 = dma.done.wait (%p1219_p5), %s180_s4, 128  }
  0x55   : > { %866 = vsyncadd (%p1219_p5), %s180_s4, 4294967168  ;;  %s650_s5 = sshll.u32 %s1073_s15, 1  ;;  %s189_s29 = scalar_lea.sflag [#allocation7], %s1073_s15 }
  0x56   : > { %s192_s16 = scalar_lea.vmem [#allocation6], %s650_s5 }
  0x57   : > { %868 = dma.done.wait (%p1219_p5), %s189_s29, 32  }
  0x58   : > { %870 = vsyncadd (%p1219_p5), %s189_s29, 4294967264  ;;  %v227_v0 = vlaneseq  ;;  %vm223_vm0 = vcmask 27648   ;;  %v901_v3 = vmov 0.0   ;;  %vm232_vm1 = vcmask 1043456   ;;  %v225_v4 = vld [vmem:[%s183_s6] sm:$0xff]  ;;  %s905_s21 = smov 127  }
  0x59   : > { %224 = vst.msk [vmem:[#allocation2] sm:$0xf] %vm223_vm0, %v901_v3  ;;  %v226_v5 = vld [vmem:[%s192_s16] sm:$0x3]  ;;  %v230_v6 = vcombine.high %v225_v4, %v225_v4  ;;  %v233_v7 = vsel %vm232_vm1, %v225_v4, -inf  ;;  %v903_v16 = vmov 1.0  }
  0x5a   : > { %v1087_v1 = vshrl.u32 %v227_v0, 7  ;;  %v234_v9 = vrot.slane %v233_v7, 4  ;;  %vm301_vm2 = vcmp.ne.s32.totalorder %v226_v5, 255  ;;  %v902_v11 = vmov 839922192   ;;  %s906_s19 = smov 1  }
  0x5b   : > { %v240_v10 = vsel %vm232_vm1, %v230_v6, -inf  ;;  %v253_v12 = vunpack.c.l.s4 %v902_v11  ;;  %v1099_v13 = vsel %vm301_vm2, 1.0, %v901_v3  ;;  %vm395_vm14 = vcmask 1040384   ;;  %s907_s30 = smov 126   ;;  %s216_s20 = scalar_lea.vmem [#allocation8], %s1073_s15 }
  0x5c   : > { %v1090_v2 = vsub.s32 1, %v1087_v1  ;;  %v235_v14 = vmax.f32 %v233_v7, %v234_v9  ;;  %v241_v15 = vrot.slane %v240_v10, 4  ;;  %v1113_v30 = vsub.s32 0, %v1087_v1  ;;  %s535_s26 = sshll.u32 %s216_s20, 4  ;;  %s658_s27 = sshll.u32 %s889_s12, 4  ;;  %s1153_s26 = int_to_ptr.vmem [resolvable:$true] %s535_s26 }
  0x5d   : > { %v254_v19 = vunpack.c.0.s8 %v253_v12  ;;  %vm398_vm15 = vcmask 1041408   ;;  %vm495_vm2 = vcmask 11272   ;;  %s1158_s3 = scalar_lea.hbm %s1207_s2, %s658_s27  ;;  %s523_s7 = scalar_lea.sflag [#allocation5], %s1073_s15 }
  0x5e   : > { %v288_v8 = vrot.slane %v226_v5, %v1090_v2  ;;  %v236_v17 = vrot.slane %v235_v14, 2  ;;  %v242_v18 = vmax.f32 %v240_v10, %v241_v15  ;;  %v1116_v34 = vrot.slane %v226_v5, %v1113_v30  ;;  %s811_s8 = scalar_lea.vmem %s1153_s26, 16  ;;  %p1220_p0 = scmp.ne.s32.totalorder %s1212_s22, 0 }
  0x5f   : > { %v257_v24 = vsub.s32 %v254_v19, %v1087_v1  ;;  %p812_p8 = scmp.ne.s32.totalorder %s1153_s26, %s811_s8  ;;  %s909_s18 = smov [#allocation8]  }
  0x60   : > { %vm290_vm3 = vcmp.eq.s32.totalorder %v1087_v1, %v288_v8  ;;  %v237_v20 = vmax.f32 %v235_v14, %v236_v17  ;;  %v243_v21 = vrot.slane %v242_v18, 2  ;;  %vm289_vm5 = vcmp.eq.s32.totalorder %v1087_v1, %v1116_v34  ;;  %s815_s12 = sshll.u32 %s909_s18, 4  ;;  %s816_s12 = int_to_ptr.vmem [resolvable:$false] %s815_s12 }
  0x61   : > { %656 = vmatprep.mubr.msk.f32.mxu0 %vm290_vm3, %v903_v16  ;;  %v258_v28 = vrot.slane %v1087_v1, %v257_v24  ;;  %v651_v40 = vsel %vm289_vm5, 1.0, %v901_v3  ;;  %v652_v41 = vsel %vm290_vm3, 1.0, %v901_v3  ;;  %p813_p7 = pnand %p812_p8, %p1220_p0  ;;  %s817_s4 = scalar_lea.vmem %s816_s12, 32 }
  0x62   : > { %v238_v22 = vrot.slane %v237_v20, 1  ;;  %v244_v23 = vmax.f32 %v242_v18, %v243_v21  ;;  %v304_v44 = vmul.f32 %v651_v40, %v225_v4  ;;  %v305_v46 = vmul.f32 %v652_v41, %v230_v6  ;;  %p818_p10 = scmp.lt.s32.totalorder %s1153_s26, %s816_s12  ;;  %p819_p12 = scmp.lt.s32.totalorder %s817_s4, %s811_s8 }
  0x63   : > { %p814_p4 = pneg %p813_p7 }
  0x64   : > { %v1105_v25 = vmax.f32 %v237_v20, %v238_v22  ;;  %v245_v26 = vrot.slane %v244_v23, 1  ;;  %v306_v52 = vsel %vm232_vm1, %v304_v44, 0.0  ;;  %v313_v54 = vsel %vm232_vm1, %v305_v46, 0.0  ;;  %p820_p1 = por %p819_p12, %p818_p10 }
  0x65   : > { %v307_v59 = vrot.slane %v306_v52, 4  ;;  %v314_v62 = vrot.slane %v313_v54, 4  ;;  %v904_v22 = vmov 1966171168  }
  0x66   : > { %v1107_v27 = vmax.f32 %v244_v23, %v245_v26  ;;  %v352_v23 = vunpack.c.l.s4 %v904_v22  ;;  %p821_p2 = pnand %p820_p1, %p814_p4 }
  0x67   : > { %v308_v5 = vadd.f32 %v307_v59, %v306_v52  ;;  %v315_v9 = vadd.f32 %v314_v62, %v313_v54  ;;  %v908_v59 = vmov 1  }
  0x68   : > { %v249_v29 = vcombine.low %v1105_v25, %v1107_v27  ;;  %738 = vset.pattern.permute.xlu1 %v908_v59  ;;  %739 = vset.pattern.permute.xlu0 %v908_v59 }
  0x69   : > { %v309_v12 = vrot.slane %v308_v5, 2  ;;  %v316_v15 = vrot.slane %v315_v9, 2 }
  0x6a   : > { %vm251_vm4 = vcmp.eq.f32.partialorder %v225_v4, %v249_v29  ;;  %v320_v31 = vsub.f32 %v225_v4, %v249_v29 }
  0x6b   : > { %v259_v32 = vsel %vm251_vm4, %v258_v28, 4  ;;  %v310_v17 = vadd.f32 %v309_v12, %v308_v5  ;;  %v317_v19 = vadd.f32 %v316_v15, %v315_v9 }
  0x6c   : > { %v260_v33 = vcombine.high %v259_v32, %v259_v32  ;;  %v321_v35 = vmul.f32 1.442695, %v320_v31  ;;  %v261_v42 = vsel %vm232_vm1, %v259_v32, 2147483647  ;;  %v353_v32 = vunpack.c.0.s8 %v352_v23 }
  0x6d   : > { %v262_v48 = vrot.slane %v261_v42, 4  ;;  %v311_v21 = vrot.slane %v310_v17, 1  ;;  %v318_v24 = vrot.slane %v317_v19, 1 }
  0x6e   : > { %v271_v36 = vsel %vm232_vm1, %v260_v33, 2147483647  ;;  %741 = vpow2.f32 %v321_v35  ;;  %v356_v41 = vsub.s32 %v353_v32, %v1087_v1 }
  0x6f   : > { %v272_v37 = vrot.slane %v271_v36, 4  ;;  %vm263_vm10 = vcmp.lt.s32.totalorder %v261_v42, %v262_v48  ;;  %v312_v28 = vadd.f32 %v311_v21, %v310_v17  ;;  %v319_v33 = vadd.f32 %v318_v24, %v317_v19 }
  0x70   : > { %v264_v63 = vsel %vm263_vm10, %v261_v42, %v262_v48 }
  0x71   : > { %vm273_vm6 = vcmp.lt.s32.totalorder %v271_v36, %v272_v37 }
  0x72   : > { %v274_v38 = vsel %vm273_vm6, %v271_v36, %v272_v37 }
  0x73   : > { %v275_v39 = vrot.slane %v274_v38, 2 }
  0x75   : > { %vm276_vm7 = vcmp.lt.s32.totalorder %v274_v38, %v275_v39 }
  0x76   : > { %v277_v43 = vsel %vm276_vm7, %v274_v38, %v275_v39 }
  0x77   : > { %v278_v45 = vrot.slane %v277_v43, 1 }
  0x78   : > { %v742_v47 = vpop.eup %741 }
  0x79   : > { %vm279_vm8 = vcmp.lt.s32.totalorder %v277_v43, %v278_v45  ;;  %v324_v49 = vcombine.high %v742_v47, %v742_v47  ;;  %v326_v50 = vsel %vm232_vm1, %v742_v47, 0.0 }
  0x7a   : > { %v280_v51 = vsel %vm279_vm8, %v277_v43, %v278_v45  ;;  %v327_v53 = vrot.slane %v326_v50, 4 }
  0x7b   : > { %vm296_vm9 = vcmp.eq.s32.totalorder %v280_v51, %v288_v8  ;;  %v333_v55 = vsel %vm232_vm1, %v324_v49, 0.0  ;;  %v265_v8 = vrot.slane %v264_v63, 2  ;;  %v388_v49 = vrot.slane %v1099_v13, %v1113_v30 }
  0x7c   : > { %v654_v56 = vsel %vm296_vm9, 1.0, %v901_v3  ;;  %v328_v57 = vadd.f32 %v327_v53, %v326_v50  ;;  %v334_v58 = vrot.slane %v333_v55, 4  ;;  %vm401_vm1 = vcmask 1042432  }
  0x7d   : > { %vm266_vm11 = vcmp.lt.s32.totalorder %v264_v63, %v265_v8  ;;  %v370_v45 = vrot.slane %v654_v56, 7  ;;  %v404_v56 = vld [vmem:[#allocation2] sm:$0xf] }
  0x7e   : > { %v329_v60 = vrot.slane %v328_v57, 2  ;;  %v335_v61 = vadd.f32 %v334_v58, %v333_v55  ;;  %v267_v18 = vsel %vm266_vm11, %v264_v63, %v265_v8 }
  0x7f   : > { %v268_v20 = vrot.slane %v267_v18, 1 }
  0x80   : > { %v330_v0 = vadd.f32 %v329_v60, %v328_v57  ;;  %v336_v4 = vrot.slane %v335_v61, 2 }
  0x81   : > { %vm269_vm12 = vcmp.lt.s32.totalorder %v267_v18, %v268_v20 }
  0x82   : > { %v331_v6 = vrot.slane %v330_v0, 1  ;;  %v337_v7 = vadd.f32 %v336_v4, %v335_v61  ;;  %v270_v37 = vsel %vm269_vm12, %v267_v18, %v268_v20 }
  0x83   : > { %vm295_vm13 = vcmp.eq.s32.totalorder %v270_v37, %v1116_v34 }
  0x84   : > { %v332_v10 = vadd.f32 %v331_v6, %v330_v0  ;;  %v338_v11 = vrot.slane %v337_v7, 1  ;;  %v653_v43 = vsel %vm295_vm13, 1.0, %v901_v3 }
  0x85   : > { %v369_v46 = vrot.slane %v653_v43, 7 }
  0x86   : > { %v339_v14 = vadd.f32 %v338_v11, %v337_v7  ;;  %743 = vlog2.f32 %v332_v10 }
  0x87   : > { %v396_v50 = vsel %vm395_vm14, 1.0, %v369_v46 }
  0x88   : > { %745 = vlog2.f32 %v339_v14 }
  0x90   : > { %v744_v26 = vpop.eup %743 }
  0x91   : > { %v341_v29 = vmul.f32 0.6931472, %v744_v26 }
  0x92   : > { %v746_v31 = vpop.eup %745 }
  0x93   : > { %v343_v35 = vmul.f32 0.6931472, %v746_v31  ;;  %v344_v36 = vadd.f32 %v341_v29, %v1105_v25  ;;  %v392_v25 = vrot.slane %v1099_v13, %v1090_v2 }
  0x95   : > { %v345_v38 = vadd.f32 %v343_v35, %v1107_v27  ;;  %v346_v39 = vsub.f32 %v344_v36, %v312_v28  ;;  %v397_v27 = vsel %vm395_vm14, 1.0, %v370_v45 }
  0x97   : > { %v347_v40 = vsub.f32 %v345_v38, %v319_v33 }
  0x99   : > { %v350_v42 = vcombine.low %v346_v39, %v347_v40 }
  0x9b   : > { %v357_v44 = vrot.slane %v350_v42, %v356_v41 }
  0x9d   : > { %v364_v47 = vrot.slane %v357_v44, %v356_v41 }
  0x9f   : > { %v366_v48 = vmul.f32 %v1099_v13, %v364_v47 }
  0xa1   : > { %v381_v51 = vrot.slane %v366_v48, %v1090_v2  ;;  %v377_v3 = vrot.slane %v366_v48, %v1113_v30 }
  0xa3   : > { %v400_v52 = vsel %vm398_vm15, %v397_v27, %v381_v51  ;;  %v399_v53 = vsel %vm398_vm15, %v396_v50, %v377_v3 }
  0xa4   : > { %v403_v54 = vsel %vm401_vm1, %v400_v52, %v392_v25  ;;  %v402_v55 = vsel %vm401_vm1, %v399_v53, %v388_v49 }
  0xa5   : > { %405 = vmatprep.subr.mxu0 %v403_v54 }
  0xa6   : > { %406 = vmatpush1.xpose.msra.mxu0 %v402_v55 }
  0xa9   : > { %657 = vmatmul.mubr.msk.f32.vlgmr.msra.gmra.mrb[0].mxu0 %vm289_vm5, %v903_v16 }
 0x17c   : > { %v471_v57 = vpop.f32.mrb[0].mxu0 }
 0x17d   : > { %v475_v13 = vadd.f32 %v471_v57, %v404_v56  ;;  %v473_v58 = vpop.f32.mrb[1].mxu0 }
 0x17f   : > { %477 = vst.msk [vmem:[#allocation2] sm:$0xf] %vm223_vm0, %v475_v13 }
 0x186   : > { %v481_v2 = vld [vmem:[#allocation2] sm:$0xf] }
 0x187   : > { %491 = vrot.lane.b32.xlu1 %v481_v2, %s905_s21  ;;  %v482_v30 = vadd.f32 1e-05, %v481_v2 }
 0x189   : > { %484 = vrot.lane.b32.xlu0 %v482_v30, %s906_s19 }
 0x18d   : > { %503 = vrot.lane.b32.xlu0 %v481_v2, %s907_s30 }
 0x1f9   : > { %v492_v61 = vpop.permute.xlu1 %491 }
 0x1fb   : > { %v485_v60 = vpop.permute.xlu0 %484 }
 0x1fc   : > { %747 = vrcp.f32 %v485_v60 }
 0x1ff   : > { %v504_v62 = vpop.permute.xlu0 %503 }
 0x206   : > { %v748_v1 = vpop.eup %747 }
 0x207   : > { %v488_v16 = vmul.f32 %v748_v1, %v482_v30 }
 0x209   : > { %v489_v34 = vsub.f32 1.0, %v488_v16 }
 0x20b   : > { %v494_v63 = vmul.f32 %v492_v61, %v489_v34  ;;  %v506_v0 = vmul.f32 %v504_v62, %v489_v34 }
 0x20d   : > { %v496_v4 = vsel %vm495_vm2, %v494_v63, 0.0  ;;  %v507_v5 = vsel %vm495_vm2, %v506_v0, 0.0 }
 0x20e   : > { %v508_v6 = vrot.slane %v507_v5, 4  ;;  %v497_v7 = vrot.slane %v496_v4, 4 }
 0x210   : > { %v509_v8 = vadd.f32 %v508_v6, %v507_v5  ;;  %v498_v10 = vadd.f32 %v497_v7, %v496_v4 }
 0x212   : > { %v510_v9 = vrot.slane %v509_v8, 2  ;;  %v499_v14 = vrot.slane %v498_v10, 2 }
 0x214   : > { %v511_v11 = vadd.f32 %v510_v9, %v509_v8  ;;  %v500_v17 = vadd.f32 %v499_v14, %v498_v10 }
 0x216   : > { %v512_v12 = vrot.slane %v511_v11, 1  ;;  %v501_v18 = vrot.slane %v500_v17, 1 }
 0x218   : > { %v513_v15 = vadd.f32 %v512_v12, %v511_v11  ;;  %v502_v19 = vadd.f32 %v501_v18, %v500_v17 }
 0x21a   : > { %749 = vrcp.f32 %v513_v15 }
 0x224   : > { %v750_v20 = vpop.eup %749 }
 0x225   : > { %v515_v21 = vmul.f32 %v750_v20, %v502_v19 }
 0x227   : > { %518 = vperm.xlu1 %738, %v515_v21  }
 0x2a6   : > { %v519_v22 = vpop.permute.xlu1 %518 }
 0x2a7   : > { %521 = vst [vmem:[%s216_s20] sm:$0x1] %v519_v22 }
 0x2a8   : > { %824 = shalt.err (!%p821_p2)
}
 0x2a9   : > { %s825_s15 = scalar_lea.hbm %s1158_s3, 16  ;;  %s829_s29 = scalar_lea.hbm %s1207_s2, 32 }
 0x2aa   : > { %p826_p9 = scmp.ne.s32.totalorder %s1158_s3, %s825_s15  ;;  %p830_p6 = scmp.lt.u32.totalorder %s1158_s3, %s1207_s2 }
 0x2ab   : > { %p831_p13 = scmp.lt.u32.totalorder %s829_s29, %s825_s15  ;;  %p833_p8 = scmp.lt.u32.totalorder %s825_s15, %s1158_s3 }
 0x2ac   : > { %p827_p11 = pnand %p826_p9, %p1220_p0 }
 0x2ad   : > { %p832_p5 = por %p831_p13, %p830_p6 }
 0x2ae   : > { %p828_p3 = pneg %p827_p11 }
 0x2af   : > { %p834_p7 = por %p833_p8, %p832_p5 }
 0x2b1   : > { %p835_p4 = pnand %p834_p7, %p828_p3 }
 0x2b3   : > { %838 = shalt.err (!%p835_p4)
}
 0x2b4   : > { %667 = dma.vmem_to_hbm [thread:$0]  (%p1220_p0), %s1153_s26, 16, %s1158_s3, %s523_s7  }
 0x2b5 PF: > { %s547_s19 = sand.u32 1, %s877_s9   ;;  %p1221_p10 = scmp.ne.s32.totalorder %s1213_s24, 0 }
 0x2b6   : > { %p1222_p12 = scmp.ge.s32.totalorder %s897_s14, 2  ;;  %s548_s30 = scalar_lea.sflag [#allocation5], %s547_s19 }
 0x2b8   : > { %p677_p1 = pnand %p1222_p12, %p1221_p10 }
 0x2ba   : > { %872 = dma.done.wait (!%p677_p1), %s548_s30, 16  }
 0x2bb   : > { %874 = vsyncadd (!%p677_p1), %s548_s30, 4294967280  ;;  %s21_s14 = sadd.s32 1, %s897_s14   ;;  %s1223_s9 = smov %s881_s10 }
 0x2bc   : > { %p18_p2 = scmp.ge.s32.totalorder %s21_s14, 4   ;;  %s1224_s10 = smov %s885_s11 }
 0x2bd   : > { %s1225_s11 = smov %s981_s23  ;;  %s1226_s12 = smov %s893_s13 }
 0x2be   : > { %s1227_s13 = smov %s1229_s17  ;;  %20 = sbr.rel (!%p18_p2) target bundleno = 8 (0x8), region = 94 }
 0x2c5   :  { %552 = vsyncpa [#allocation4], 1 }
 0x2c6   :  { %554 = vsyncpa [#allocation4 + $0x1], 1 }
 0x2c7   :  { %555 = vsyncpa [#allocation7], 1 }
 0x2c8   :  { %557 = vsyncpa [#allocation7 + $0x1], 1 }
 0x2c9   :  { %558 = vsyncpa [#allocation5], 1 }
 0x2ca   :  { %560 = vsyncpa [#allocation5 + $0x1], 1 }

</bundles_post_ra>
